<compile_context>
chip_gen: v5e
topology: v5e:2x2
jax: 0.10.0
libtpu: 0.0.40
codegen_flags: <defaults>
</compile_context>

<pallas_src>
import jax
import jax.numpy as jnp
from jax.experimental import pallas as pl
from jax.experimental.pallas import tpu as pltpu

_TARGET_BLOCK_BYTES = 4 * 1024 * 1024  # ~4 MiB per x/out block


def _droppath_kernel(mask_ref, x_ref, o_ref):
    """mask_ref: (TILE_B, 1) f32 (0 or 1/keep_prob per sample).
    x_ref / o_ref: (TILE_B, TILE_F) tiles of the flattened input/output."""
    o_ref[...] = x_ref[...] * mask_ref[...].astype(x_ref.dtype)


def _choose_tiles(B, flat, itemsize):
    """Sublane-dense TILE_B (B itself when small, else 8) and lane-dense
    TILE_F (multiple of 128, ~4 MiB block budget, never exceeding flat)."""
    tile_b = B if B <= 8 else 8
    if flat <= 128:
        tile_f = flat                           # full-array-dim exception
    else:
        budget_f = max(128, _TARGET_BLOCK_BYTES // (tile_b * itemsize))
        budget_f = (budget_f // 128) * 128
        tile_f = min(budget_f, (flat // 128) * 128)
    return tile_b, tile_f


def drop_path(x, key, drop_prob, scale_by_keep=True, training=True,
              donate_x=False):
    """JAX wrapper matching DropPath.forward for any x.ndim >= 1."""
    if drop_prob <= 0.0 or not training:
        return x

    keep_prob = 1.0 - drop_prob
    orig_shape = x.shape
    B = orig_shape[0]
    flat = 1
    for d in orig_shape[1:]:
        flat *= d

    # Per-sample keep mask, pre-scaled, computed OUTSIDE the kernel (B tiny).
    mask = jax.random.bernoulli(key, p=keep_prob, shape=(B,)).astype(jnp.float32)
    if keep_prob > 0.0 and scale_by_keep:
        mask = mask / keep_prob
    mask2d = mask.reshape(B, 1)

    x_flat = x.reshape(B, flat)
    itemsize = jnp.dtype(x.dtype).itemsize
    tile_b, tile_f = _choose_tiles(B, flat, itemsize)
    n_b = pl.cdiv(B, tile_b)
    n_f = pl.cdiv(flat, tile_f)

    # 2 double-buffered x blocks + 2 output blocks (+ tiny mask) + headroom.
    block_bytes = tile_b * tile_f * itemsize
    vmem_limit = int(min(64 * 1024 * 1024,
                         max(4 * block_bytes + 2 * 1024 * 1024,
                             16 * 1024 * 1024)))

    extra = {}
    if donate_x:
        # Reuse x's HBM buffer for the output when the caller donates x.
        extra["input_output_aliases"] = {1: 0}

    out = pl.pallas_call(
        _droppath_kernel,
        out_shape=jax.ShapeDtypeStruct((B, flat), x.dtype),
        grid=(n_f, n_b),
        in_specs=[
            pl.BlockSpec((tile_b, 1), lambda f, b: (b, 0)),        # mask
            pl.BlockSpec((tile_b, tile_f), lambda f, b: (b, f)),   # x
        ],
        out_specs=pl.BlockSpec((tile_b, tile_f), lambda f, b: (b, f)),
        compiler_params=pltpu.CompilerParams(
            dimension_semantics=("parallel", "parallel"),
            vmem_limit_bytes=vmem_limit,
        ),
        **extra,
    )(mask2d, x_flat)

    return out.reshape(orig_shape)


if __name__ == "__main__":
    key = jax.random.PRNGKey(0)
    data_key, mask_key, data_key2, mask_key2 = jax.random.split(key, 4)

    ok = True

    # --- Test 1: ViT sequence layout (batch, tokens, hidden) -------------
    B, N, D = 2, 8, 32
    x = jax.random.normal(data_key, (B, N, D), dtype=jnp.float32)
    drop_prob = 0.25
    keep_prob = 1.0 - drop_prob

    out = drop_path(x, mask_key, drop_prob=drop_prob, scale_by_keep=True,
                    training=True)
    out = jax.block_until_ready(out)

    mask_ref = jax.random.bernoulli(mask_key, p=keep_prob, shape=(B,)).astype(
        jnp.float32) / keep_prob
    expected = x * mask_ref.reshape(B, 1, 1)
    ok = ok and bool(jnp.allclose(out, expected, rtol=1e-6, atol=1e-6))

    # Per-sample, output is either exactly 0 or x / keep_prob.
    for b in range(B):
        zero = bool(jnp.all(out[b] == 0.0))
        scaled = bool(jnp.allclose(out[b], x[b] / keep_prob, rtol=1e-6, atol=1e-6))
        ok = ok and (zero or scaled)

    # --- Test 2: non-128-divisible flattened size (ragged last block) ----
    x2 = jax.random.normal(data_key2, (3, 5, 7, 9), dtype=jnp.float32)
    dp2 = 0.5
    out2 = drop_path(x2, mask_key2, drop_prob=dp2, scale_by_keep=True,
                     training=True)
    out2 = jax.block_until_ready(out2)
    mask_ref2 = jax.random.bernoulli(mask_key2, p=1.0 - dp2, shape=(3,)).astype(
        jnp.float32) / (1.0 - dp2)
    expected2 = x2 * mask_ref2.reshape(3, 1, 1, 1)
    ok = ok and bool(jnp.allclose(out2, expected2, rtol=1e-6, atol=1e-6))

    # --- Identity paths (no kernel launch) --------------------------------
    ident = drop_path(x, mask_key, drop_prob=drop_prob, training=False)
    ok = ok and bool(jnp.array_equal(ident, x))
    ident2 = drop_path(x, mask_key, drop_prob=0.0, training=True)
    ok = ok and bool(jnp.array_equal(ident2, x))

    if ok:
        print("KERNEL_OK")
    else:
        print("KERNEL_MISMATCH")
</pallas_src>

<mosaic_0001>
module attributes {stable_mosaic.version = 11 : i64} {
  func.func @_droppath_kernel(%arg0: i32, %arg1: i32, %arg2: memref<2x1xf32, #tpu.memory_space<vmem>>, %arg3: memref<2x256xf32, #tpu.memory_space<vmem>>, %arg4: memref<2x256xf32, #tpu.memory_space<vmem>>) attributes {dimension_semantics = [#tpu.dimension_semantics<parallel>, #tpu.dimension_semantics<parallel>], iteration_bounds = array<i64: 1, 1>, scalar_prefetch = 0 : i64, scratch_operands = 0 : i64, tpu.core_type = #tpu.core_type<tc>, window_params = [{transform_indices = @transform_0, window_bounds = array<i64: 2, 1>}, {transform_indices = @transform_1, window_bounds = array<i64: 2, 256>}, {transform_indices = @transform_2, window_bounds = array<i64: 2, 256>}]} {
    %c0 = arith.constant 0 : index
    %c0_0 = arith.constant 0 : index
    %0 = vector.load %arg3[%c0, %c0_0] : memref<2x256xf32, #tpu.memory_space<vmem>>, vector<2x256xf32>
    %c0_1 = arith.constant 0 : index
    %c0_2 = arith.constant 0 : index
    %1 = vector.load %arg2[%c0_1, %c0_2] : memref<2x1xf32, #tpu.memory_space<vmem>>, vector<2x1xf32>
    %2 = vector.broadcast %1 : vector<2x1xf32> to vector<2x256xf32>
    %3 = arith.mulf %0, %2 : vector<2x256xf32>
    %c0_3 = arith.constant 0 : index
    %c0_4 = arith.constant 0 : index
    %4 = vector.load %arg4[%c0_3, %c0_4] : memref<2x256xf32, #tpu.memory_space<vmem>>, vector<2x256xf32>
    tpu.vector_store %arg4[%c0_3, %c0_4], %3 {strides = array<i32>} : memref<2x256xf32, #tpu.memory_space<vmem>>, vector<2x256xf32>,
    return
  }
  func.func @transform_0(%arg0: i32, %arg1: i32) -> (i32, i32) {
    %c0_i32 = arith.constant 0 : i32
    %c0_i32_0 = arith.constant 0 : i32
    return %arg1, %c0_i32 : i32, i32
  }
  func.func @transform_1(%arg0: i32, %arg1: i32) -> (i32, i32) {
    %c0_i32 = arith.constant 0 : i32
    return %arg1, %arg0 : i32, i32
  }
  func.func @transform_2(%arg0: i32, %arg1: i32) -> (i32, i32) {
    %c0_i32 = arith.constant 0 : i32
    return %arg1, %arg0 : i32, i32
  }
}

</mosaic_0001>

<bundles_post_ra>
// kernel: tpu_custom_call.1
= control target key start
LH: loop header
LB: loop body
LE: loop exit
PB: predicated region body
PF: predicated region fallthrough
CT: control target
= control target key end

     0   :  { %7 = vsyncpa [#allocation3], 0  ;;  %s141_s0 = inlined_call_operand.vmem [shape: f32[2,1], index: 0, kind: input, shape index: {}]   ;;  %s142_s1 = inlined_call_operand.hbm [shape: f32[2,256], index: 1, kind: input, shape index: {}]   ;;  %s143_s2 = inlined_call_operand.hbm [shape: f32[2,256], index: 2, kind: output, shape index: {}]  }
   0x1   :  { %8 = vsyncpa [#allocation4], 0  ;;  %s16_s11 = sshll.u32 %s142_s1, 4  ;;  %s113_s12 = smov [#allocation2]   ;;  %s17_s11 = int_to_ptr.hbm [resolvable:$true] %s16_s11 }
   0x2   :  { %s18_s13 = sshll.u32 %s113_s12, 4  ;;  %s19_s13 = int_to_ptr.vmem [resolvable:$true] %s18_s13 }
   0x3   :  { %21 = dma.hbm_to_vmem [thread:$0]  %s17_s11, 64, %s19_s13, [#allocation3]  }
   0x4   :  { %109 = dma.done.wait [#allocation3], 64  }
   0x5   :  { %110 = vsyncadd [#allocation3], 4294967232  ;;  %v114_v0 = vmov 0   ;;  %v27_v1 = vld [vmem:[%s141_s0] sm:$0x3]  ;;  %s116_s1 = smov [#allocation5]  }
   0x6   :  { %60 = vset.pattern.permute.xlu0 %v114_v0  ;;  %v115_v2 = vmov 269488144   ;;  %v26_v6 = vld [vmem:[#allocation2] sm:$0xf]  ;;  %s44_s16 = sshll.u32 %s116_s1, 4  ;;  %s46_s19 = sshll.u32 %s143_s2, 4  ;;  %s45_s16 = int_to_ptr.vmem [resolvable:$true] %s44_s16  ;;  %s47_s19 = int_to_ptr.hbm [resolvable:$true] %s46_s19 }
   0x7   :  { %30 = vperm.xlu0 %60, %v27_v1   ;;  %v33_v3 = vunpack.c.l.s4 %v115_v2 }
   0x9   :  { %v34_v4 = vunpack.c.0.s8 %v33_v3 }
  0x79   :  { %v31_v5 = vpop.permute.xlu0 %30 }
  0x7a   :  { %v35_v7 = vperm.slane %v31_v5, %v34_v4 }
  0x7c   :  { %v37_v8 = vmul.f32 %v35_v7, %v26_v6 }
  0x7e   :  { %38 = vst [vmem:[#allocation5] sm:$0xf] %v37_v8 }
  0x7f   :  { %49 = dma.vmem_to_hbm [thread:$0]  %s45_s16, 64, %s47_s19, [#allocation4]  }
  0x80   :  { %111 = dma.done.wait [#allocation4], 64  }
  0x81   :  { %112 = vsyncadd [#allocation4], 4294967232 }
  0x82   :  { %54 = vsyncpa [#allocation3], 1 }
  0x83   :  { %55 = vsyncpa [#allocation4], 1 }

</bundles_post_ra>
